<compile_context>
chip_gen: v7x
topology: tpu7x:2x2x1
jax: 0.10.0
libtpu: 0.0.40
codegen_flags: <defaults>
</compile_context>

<pallas_src>
import functools

import jax
import jax.numpy as jnp
import numpy as np
from jax.experimental import pallas as pl
from jax.experimental.pallas import tpu as pltpu


def _round_up(v, m):
    return (v + m - 1) // m * m


def bottleneck_kernel(x_ref, m_ref, w1_ref, w2_ref, w3s_ref, out_ref, *, width):
    # x_ref   : (Cin, H*W)      one image; channels on sublanes, pixels on lanes
    # m_ref   : (9, H*W)        0/1 border mask per 3x3 tap
    # w1_ref  : (P8, Cin)       conv1 1x1
    # w2_ref  : (P8, 9*P8)      conv2 3x3, columns ordered (tap = ky*3+kx, ci)
    # w3s_ref : (Cout, P8+Cin)  [conv3 | shortcut] 1x1 fused along K
    # out_ref : (Cout, H*W)
    hw = x_ref.shape[1]
    f32 = jnp.float32

    # pre-activation ReLU (feeds both conv1 and the fused shortcut)
    xr = jnp.maximum(x_ref[...].astype(f32), 0.0)                        # (Cin, HW)

    # conv1 (1x1) + ReLU : one MXU matmul, pixels stay on the lane axis
    h1 = jnp.maximum(
        jnp.dot(w1_ref[...], xr, preferred_element_type=f32), 0.0)       # (P8, HW)

    # conv2 (3x3, stride=1, pad=1): im2col via lane rolls + border masks,
    # then ONE K=9*P8 matmul instead of nine tiny-K matmuls.
    taps = []
    for ky in range(3):
        for kx in range(3):
            t = ky * 3 + kx
            s = (ky - 1) * width + (kx - 1)       # lane offset of this tap
            if s == 0:
                taps.append(h1)                   # centre tap: no shift, no mask
            else:
                rolled = pltpu.roll(h1, shift=(-s) % hw, axis=1)
                taps.append(rolled * m_ref[t:t + 1, :])
    im2col = jnp.concatenate(taps, axis=0)                               # (9*P8, HW)
    h2 = jnp.maximum(
        jnp.dot(w2_ref[...], im2col, preferred_element_type=f32), 0.0)   # (P8, HW)

    # conv3 (1x1) fused with the shortcut (1x1): one matmul yields h3 + sc
    cat = jnp.concatenate([h2, xr], axis=0)                              # (P8+Cin, HW)
    out = jnp.dot(w3s_ref[...], cat, preferred_element_type=f32)         # (Cout, HW)
    out_ref[...] = out.astype(out_ref.dtype)


def preact_bottleneck(x_nchw, w1, w2, w3, ws):
    """x_nchw: (N, Cin, H, W); conv weights in PyTorch OIHW layout."""
    N, Cin, H, W = x_nchw.shape
    P = w1.shape[0]
    Cout = w3.shape[0]
    HW = H * W
    P8 = _round_up(P, 8)          # pad planes to a sublane multiple
    f32 = jnp.float32

    # ---- one-time host/XLA-side weight packing ----
    # conv1: (P, Cin, 1, 1) -> (P8, Cin)
    w1m = jnp.zeros((P8, Cin), f32).at[:P, :].set(w1[:, :, 0, 0].astype(f32))
    # conv2: (P, P, 3, 3) -> (P8, 9*P8), columns ordered (tap = ky*3+kx, ci)
    w2m = jnp.zeros((P8, 9 * P8), f32)
    for ky in range(3):
        for kx in range(3):
            t = ky * 3 + kx
            w2m = w2m.at[:P, t * P8:t * P8 + P].set(w2[:, :, ky, kx].astype(f32))
    # conv3 + shortcut stacked along K: (Cout, P8 + Cin)
    w3sm = jnp.zeros((Cout, P8 + Cin), f32)
    w3sm = w3sm.at[:, :P].set(w3[:, :, 0, 0].astype(f32))
    w3sm = w3sm.at[:, P8:].set(ws[:, :, 0, 0].astype(f32))

    # 0/1 border masks for the nine 3x3 taps (tiny, VMEM-resident across grid)
    yy, xx = np.arange(HW) // W, np.arange(HW) % W
    masks = np.zeros((9, HW), np.float32)
    for ky in range(3):
        for kx in range(3):
            dy, dx = ky - 1, kx - 1
            ok = (yy + dy >= 0) & (yy + dy < H) & (xx + dx >= 0) & (xx + dx < W)
            masks[ky * 3 + kx] = ok.astype(np.float32)
    masks = jnp.asarray(masks)

    # NCHW -> (N, Cin, H*W): contiguous reshape, no transpose needed
    x = x_nchw.reshape(N, Cin, HW)

    kernel = functools.partial(bottleneck_kernel, width=W)
    out = pl.pallas_call(
        kernel,
        out_shape=jax.ShapeDtypeStruct((N, Cout, HW), x_nchw.dtype),
        grid=(N,),
        in_specs=[
            pl.BlockSpec((None, Cin, HW), lambda n: (n, 0, 0)),   # per-image tile
            pl.BlockSpec((9, HW), lambda n: (0, 0)),              # resident
            pl.BlockSpec((P8, Cin), lambda n: (0, 0)),            # resident
            pl.BlockSpec((P8, 9 * P8), lambda n: (0, 0)),         # resident
            pl.BlockSpec((Cout, P8 + Cin), lambda n: (0, 0)),     # resident
        ],
        out_specs=pl.BlockSpec((None, Cout, HW), lambda n: (n, 0, 0)),
        compiler_params=pltpu.CompilerParams(
            dimension_semantics=("parallel",)),     # shards batch on v7x's 2 TCs
    )(x, masks, w1m, w2m, w3sm)
    # (N, Cout, H*W) -> NCHW, contiguous reshape (free)
    return out.reshape(N, Cout, H, W)


def reference(x_nchw, w1, w2, w3, ws):
    """Pure-JAX reference with identical semantics (NCHW convs)."""
    dn = ("NCHW", "OIHW", "NCHW")

    def conv(x, w, pad):
        return jax.lax.conv_general_dilated(
            x, w, (1, 1), pad, dimension_numbers=dn,
            precision=jax.lax.Precision.HIGHEST)

    out = jax.nn.relu(x_nchw)
    sc = conv(out, ws, "VALID")
    h = jax.nn.relu(conv(out, w1, "VALID"))
    h = jax.nn.relu(conv(h, w2, ((1, 1), (1, 1))))
    h = conv(h, w3, "VALID")
    return h + sc


if __name__ == "__main__":
    # Small synthetic config: in_planes=8, planes=4, expansion=4 -> out=16,
    # stride=1 with in_planes != 4*planes so the shortcut conv exists.
    N, Cin, H, W = 2, 8, 16, 16
    planes = 4
    expansion = 4
    Cout = expansion * planes

    key = jax.random.PRNGKey(0)
    kx, k1, k2, k3, ks = jax.random.split(key, 5)
    x = jax.random.normal(kx, (N, Cin, H, W), dtype=jnp.float32)
    # PyTorch conv weight layout: (out_ch, in_ch, kh, kw); deterministic init.
    w1 = 0.2 * jax.random.normal(k1, (planes, Cin, 1, 1), dtype=jnp.float32)
    w2 = 0.2 * jax.random.normal(k2, (planes, planes, 3, 3), dtype=jnp.float32)
    w3 = 0.2 * jax.random.normal(k3, (Cout, planes, 1, 1), dtype=jnp.float32)
    ws = 0.2 * jax.random.normal(ks, (Cout, Cin, 1, 1), dtype=jnp.float32)

    # TODO(synk): the Geometry_nn xSPD (SPD-manifold) branch is None in this
    # forward and has no public spec, so only the regular tensor path is kernelized.

    out = preact_bottleneck(x, w1, w2, w3, ws)
    out = jax.block_until_ready(out)

    ref = reference(x, w1, w2, w3, ws)
    np.testing.assert_allclose(np.asarray(out), np.asarray(ref), rtol=1e-2, atol=1e-2)
    print("KERNEL_OK")
</pallas_src>

<mosaic_0001>
module attributes {stable_mosaic.version = 11 : i64} {
  func.func @bottleneck_kernel(%arg0: i32, %arg1: memref<1x8x256xf32, #tpu.memory_space<vmem>>, %arg2: memref<9x256xf32, #tpu.memory_space<vmem>>, %arg3: memref<8x8xf32, #tpu.memory_space<vmem>>, %arg4: memref<8x72xf32, #tpu.memory_space<vmem>>, %arg5: memref<16x16xf32, #tpu.memory_space<vmem>>, %arg6: memref<1x16x256xf32, #tpu.memory_space<vmem>>) attributes {dimension_semantics = [#tpu.dimension_semantics<parallel>], iteration_bounds = array<i64: 2>, scalar_prefetch = 0 : i64, scratch_operands = 0 : i64, tpu.core_type = #tpu.core_type<tc>, window_params = [{transform_indices = @transform_0, window_bounds = array<i64: 1, 8, 256>}, {pipeline_mode = #tpu.pipeline_mode<synchronous>, transform_indices = @transform_1, window_bounds = array<i64: 9, 256>}, {pipeline_mode = #tpu.pipeline_mode<synchronous>, transform_indices = @transform_2, window_bounds = array<i64: 8, 8>}, {pipeline_mode = #tpu.pipeline_mode<synchronous>, transform_indices = @transform_3, window_bounds = array<i64: 8, 72>}, {pipeline_mode = #tpu.pipeline_mode<synchronous>, transform_indices = @transform_4, window_bounds = array<i64: 16, 16>}, {transform_indices = @transform_5, window_bounds = array<i64: 1, 16, 256>}]} {
    %c0 = arith.constant 0 : index
    %c0_0 = arith.constant 0 : index
    %c0_1 = arith.constant 0 : index
    %0 = vector.load %arg1[%c0, %c0_0, %c0_1] : memref<1x8x256xf32, #tpu.memory_space<vmem>>, vector<1x8x256xf32>
    %1 = vector.shape_cast %0 : vector<1x8x256xf32> to vector<8x256xf32>
    %cst = arith.constant 0.000000e+00 : f32
    %2 = vector.broadcast %cst : f32 to vector<8x256xf32>
    %3 = arith.maximumf %1, %2 : vector<8x256xf32>
    %c0_2 = arith.constant 0 : index
    %c0_3 = arith.constant 0 : index
    %4 = vector.load %arg3[%c0_2, %c0_3] : memref<8x8xf32, #tpu.memory_space<vmem>>, vector<8x8xf32>
    %cst_4 = arith.constant dense<0.000000e+00> : vector<8x256xf32>
    %5 = tpu.matmul %4, %3, %cst_4 {dimension_numbers = #tpu.dot_dimension_numbers<[1], [0], [0], [1], [0, 0, 1, 1], [], []>} : vector<8x8xf32>, vector<8x256xf32>, vector<8x256xf32> -> vector<8x256xf32>
    %cst_5 = arith.constant 0.000000e+00 : f32
    %6 = vector.broadcast %cst_5 : f32 to vector<8x256xf32>
    %7 = arith.maximumf %5, %6 : vector<8x256xf32>
    %c17_i32 = arith.constant 17 : i32
    %8 = tpu.dynamic_rotate %7 by %c17_i32 dim 1 : vector<8x256xf32>, i32 -> vector<8x256xf32>
    %c0_6 = arith.constant 0 : index
    %c0_7 = arith.constant 0 : index
    %9 = vector.load %arg2[%c0_6, %c0_7] : memref<9x256xf32, #tpu.memory_space<vmem>>, vector<1x256xf32>
    %10 = vector.broadcast %9 : vector<1x256xf32> to vector<8x256xf32>
    %11 = arith.mulf %8, %10 : vector<8x256xf32>
    %c16_i32 = arith.constant 16 : i32
    %12 = tpu.dynamic_rotate %7 by %c16_i32 dim 1 : vector<8x256xf32>, i32 -> vector<8x256xf32>
    %c1 = arith.constant 1 : index
    %c0_8 = arith.constant 0 : index
    %13 = vector.load %arg2[%c1, %c0_8] : memref<9x256xf32, #tpu.memory_space<vmem>>, vector<1x256xf32>
    %14 = vector.broadcast %13 : vector<1x256xf32> to vector<8x256xf32>
    %15 = arith.mulf %12, %14 : vector<8x256xf32>
    %c15_i32 = arith.constant 15 : i32
    %16 = tpu.dynamic_rotate %7 by %c15_i32 dim 1 : vector<8x256xf32>, i32 -> vector<8x256xf32>
    %c2 = arith.constant 2 : index
    %c0_9 = arith.constant 0 : index
    %17 = vector.load %arg2[%c2, %c0_9] : memref<9x256xf32, #tpu.memory_space<vmem>>, vector<1x256xf32>
    %18 = vector.broadcast %17 : vector<1x256xf32> to vector<8x256xf32>
    %19 = arith.mulf %16, %18 : vector<8x256xf32>
    %c1_i32 = arith.constant 1 : i32
    %20 = tpu.dynamic_rotate %7 by %c1_i32 dim 1 : vector<8x256xf32>, i32 -> vector<8x256xf32>
    %c3 = arith.constant 3 : index
    %c0_10 = arith.constant 0 : index
    %21 = vector.load %arg2[%c3, %c0_10] : memref<9x256xf32, #tpu.memory_space<vmem>>, vector<1x256xf32>
    %22 = vector.broadcast %21 : vector<1x256xf32> to vector<8x256xf32>
    %23 = arith.mulf %20, %22 : vector<8x256xf32>
    %c255_i32 = arith.constant 255 : i32
    %24 = tpu.dynamic_rotate %7 by %c255_i32 dim 1 : vector<8x256xf32>, i32 -> vector<8x256xf32>
    %c5 = arith.constant 5 : index
    %c0_11 = arith.constant 0 : index
    %25 = vector.load %arg2[%c5, %c0_11] : memref<9x256xf32, #tpu.memory_space<vmem>>, vector<1x256xf32>
    %26 = vector.broadcast %25 : vector<1x256xf32> to vector<8x256xf32>
    %27 = arith.mulf %24, %26 : vector<8x256xf32>
    %c241_i32 = arith.constant 241 : i32
    %28 = tpu.dynamic_rotate %7 by %c241_i32 dim 1 : vector<8x256xf32>, i32 -> vector<8x256xf32>
    %c6 = arith.constant 6 : index
    %c0_12 = arith.constant 0 : index
    %29 = vector.load %arg2[%c6, %c0_12] : memref<9x256xf32, #tpu.memory_space<vmem>>, vector<1x256xf32>
    %30 = vector.broadcast %29 : vector<1x256xf32> to vector<8x256xf32>
    %31 = arith.mulf %28, %30 : vector<8x256xf32>
    %c240_i32 = arith.constant 240 : i32
    %32 = tpu.dynamic_rotate %7 by %c240_i32 dim 1 : vector<8x256xf32>, i32 -> vector<8x256xf32>
    %c7 = arith.constant 7 : index
    %c0_13 = arith.constant 0 : index
    %33 = vector.load %arg2[%c7, %c0_13] : memref<9x256xf32, #tpu.memory_space<vmem>>, vector<1x256xf32>
    %34 = vector.broadcast %33 : vector<1x256xf32> to vector<8x256xf32>
    %35 = arith.mulf %32, %34 : vector<8x256xf32>
    %c239_i32 = arith.constant 239 : i32
    %36 = tpu.dynamic_rotate %7 by %c239_i32 dim 1 : vector<8x256xf32>, i32 -> vector<8x256xf32>
    %c8 = arith.constant 8 : index
    %c0_14 = arith.constant 0 : index
    %37 = vector.load %arg2[%c8, %c0_14] : memref<9x256xf32, #tpu.memory_space<vmem>>, vector<1x256xf32>
    %38 = vector.broadcast %37 : vector<1x256xf32> to vector<8x256xf32>
    %39 = arith.mulf %36, %38 : vector<8x256xf32>
    %40 = tpu.concatenate %11, %15, %19, %23, %7, %27, %31, %35, %39 in 0 : vector<8x256xf32>, vector<8x256xf32>, vector<8x256xf32>, vector<8x256xf32>, vector<8x256xf32>, vector<8x256xf32>, vector<8x256xf32>, vector<8x256xf32>, vector<8x256xf32> -> vector<72x256xf32>
    %c0_15 = arith.constant 0 : index
    %c0_16 = arith.constant 0 : index
    %41 = vector.load %arg4[%c0_15, %c0_16] : memref<8x72xf32, #tpu.memory_space<vmem>>, vector<8x72xf32>
    %cst_17 = arith.constant dense<0.000000e+00> : vector<8x256xf32>
    %42 = tpu.matmul %41, %40, %cst_17 {dimension_numbers = #tpu.dot_dimension_numbers<[1], [0], [0], [1], [0, 0, 1, 1], [], []>} : vector<8x72xf32>, vector<72x256xf32>, vector<8x256xf32> -> vector<8x256xf32>
    %cst_18 = arith.constant 0.000000e+00 : f32
    %43 = vector.broadcast %cst_18 : f32 to vector<8x256xf32>
    %44 = arith.maximumf %42, %43 : vector<8x256xf32>
    %45 = tpu.concatenate %44, %3 in 0 : vector<8x256xf32>, vector<8x256xf32> -> vector<16x256xf32>
    %c0_19 = arith.constant 0 : index
    %c0_20 = arith.constant 0 : index
    %46 = vector.load %arg5[%c0_19, %c0_20] : memref<16x16xf32, #tpu.memory_space<vmem>>, vector<16x16xf32>
    %cst_21 = arith.constant dense<0.000000e+00> : vector<16x256xf32>
    %47 = tpu.matmul %46, %45, %cst_21 {dimension_numbers = #tpu.dot_dimension_numbers<[1], [0], [0], [1], [0, 0, 1, 1], [], []>} : vector<16x16xf32>, vector<16x256xf32>, vector<16x256xf32> -> vector<16x256xf32>
    %c0_22 = arith.constant 0 : index
    %c0_23 = arith.constant 0 : index
    %c0_24 = arith.constant 0 : index
    %48 = vector.load %arg6[%c0_22, %c0_23, %c0_24] : memref<1x16x256xf32, #tpu.memory_space<vmem>>, vector<1x16x256xf32>
    %49 = vector.shape_cast %48 : vector<1x16x256xf32> to vector<16x256xf32>
    %50 = vector.shape_cast %47 : vector<16x256xf32> to vector<1x16x256xf32>
    tpu.vector_store %arg6[%c0_22, %c0_23, %c0_24], %50 {strides = array<i32>} : memref<1x16x256xf32, #tpu.memory_space<vmem>>, vector<1x16x256xf32>,
    return
  }
  func.func @transform_0(%arg0: i32) -> (i32, i32, i32) {
    %c0_i32 = arith.constant 0 : i32
    %c0_i32_0 = arith.constant 0 : i32
    %c0_i32_1 = arith.constant 0 : i32
    return %arg0, %c0_i32, %c0_i32_0 : i32, i32, i32
  }
  func.func @transform_1(%arg0: i32) -> (i32, i32) {
    %c0_i32 = arith.constant 0 : i32
    %c0_i32_0 = arith.constant 0 : i32
    %c0_i32_1 = arith.constant 0 : i32
    return %c0_i32, %c0_i32_0 : i32, i32
  }
  func.func @transform_2(%arg0: i32) -> (i32, i32) {
    %c0_i32 = arith.constant 0 : i32
    %c0_i32_0 = arith.constant 0 : i32
    %c0_i32_1 = arith.constant 0 : i32
    return %c0_i32, %c0_i32_0 : i32, i32
  }
  func.func @transform_3(%arg0: i32) -> (i32, i32) {
    %c0_i32 = arith.constant 0 : i32
    %c0_i32_0 = arith.constant 0 : i32
    %c0_i32_1 = arith.constant 0 : i32
    return %c0_i32, %c0_i32_0 : i32, i32
  }
  func.func @transform_4(%arg0: i32) -> (i32, i32) {
    %c0_i32 = arith.constant 0 : i32
    %c0_i32_0 = arith.constant 0 : i32
    %c0_i32_1 = arith.constant 0 : i32
    return %c0_i32, %c0_i32_0 : i32, i32
  }
  func.func @transform_5(%arg0: i32) -> (i32, i32, i32) {
    %c0_i32 = arith.constant 0 : i32
    %c0_i32_0 = arith.constant 0 : i32
    %c0_i32_1 = arith.constant 0 : i32
    return %arg0, %c0_i32, %c0_i32_0 : i32, i32, i32
  }
}

</mosaic_0001>

<bundles_post_ra>
// kernel: tpu_custom_call.1
= control target key start
LH: loop header
LB: loop body
LE: loop exit
PB: predicated region body
PF: predicated region fallthrough
CT: control target
= control target key end

     0   :  { %10 = vsyncpa [#allocation3], 0  ;;  %s1551_s0 = inlined_call_operand.hbm [shape: f32[2,8,256], index: 0, kind: input, shape index: {}]   ;;  %s1552_s1 = inlined_call_operand.hbm [shape: f32[9,256], index: 1, kind: input, shape index: {}]   ;;  %s1553_s2 = inlined_call_operand.hbm [shape: f32[8,8], index: 2, kind: input, shape index: {}]   ;;  %s1554_s3 = inlined_call_operand.vmem [shape: f32[8,72], index: 3, kind: input, shape index: {}]   ;;  %s1555_s4 = inlined_call_operand.hbm [shape: f32[16,16], index: 4, kind: input, shape index: {}]   ;;  %s1556_s5 = inlined_call_operand.hbm [shape: f32[2,16,256], index: 5, kind: output, shape index: {}]  }
   0x1   :  { %12 = vsyncpa [#allocation3 + $0x1], 0 }
   0x2   :  { %13 = vsyncpa [#allocation6], 0 }
   0x3   :  { %14 = vsyncpa [#allocation9], 0 }
   0x4   :  { %15 = vsyncpa [#allocation4], 0 }
   0x5   :  { %17 = vsyncpa [#allocation4 + $0x1], 0  ;;  %s1202_s18 = smov 0   ;;  %s1204_s19 = smov 0  }
   0x6   :  { %s1206_s20 = smov 0   ;;  %s1208_s21 = smov 0  }
   0x7 LB: > { %s1223_s22 = sadd.s32 4294967295, %s1151_s21   ;;  %s826_s23 = sadd.s32 4294967294, %s1151_s21   ;;  %s1151_s21 = sphi %s1208_s21, %s1579_s21   ;;  %s1147_s20 = sphi %s1206_s20, %s1578_s20   ;;  %s1143_s19 = sphi %s1204_s19, %s1577_s19   ;;  %s1139_s18 = sphi %s1202_s18, %s1576_s18  }
   0x8   : > { %p43_p0 = scmp.ne.s32.totalorder %s1143_s19, %s1139_s18  ;;  %p1557_p1 = scmp.eq.s32.totalorder %s1223_s22, 0 }
   0x9   : > { %p157_p3 = scmp.eq.s32.totalorder %s826_s23, 1  ;;  %p827_p5 = scmp.ge.s32.totalorder %s1151_s21, 1 }
   0xa   : > { %p1232_p4 = por %p1557_p1, %p43_p0  ;;  %p164_p7 = scmp.lt.s32.totalorder %s1151_s21, 3 }
   0xb   : > { %p1237_p6 = por %p157_p3, %p43_p0  ;;  %s1153_s27 = smov [#allocation5]  }
   0xc   : > { %s1560_s24 = scalar_select %p1232_p4, 1, 0 }
   0xd   : > { %s1561_s25 = scalar_select %p1237_p6, 1, 0 }
   0xe   : > { %p1242_p8 = pnand %p827_p5, %p164_p7  ;;  %s176_s28 = sshll.u32 %s1153_s27, 4  ;;  %s1246_s28 = int_to_ptr.vmem [resolvable:$true] %s176_s28 }
   0xf   : > { %s1154_s30 = smov [#allocation7]   ;;  %s1155_s7 = smov [#allocation8]  }
  0x10   : > { %s1562_s26 = scalar_select %p1242_p8, 1, 0 }
  0x11   : > { %p888_p9 = pneg %p1242_p8  ;;  %s190_s6 = sshll.u32 %s1154_s30, 4  ;;  %s1257_s6 = int_to_ptr.vmem [resolvable:$true] %s190_s6 }
  0x12   : > { %s1259_s8 = sshll.u32 %s1155_s7, 4  ;;  %s963_s11 = scalar_lea.hbm %s1552_s1, 512  ;;  %s204_s8 = int_to_ptr.vmem [resolvable:$true] %s1259_s8 }
  0x13   : > { %p1253_p11 = pnand %p888_p9, %p1557_p1  ;;  %p964_p12 = scmp.ne.s32.totalorder %s1552_s1, %s963_s11 }
  0x14   : > { %p970_p5 = scmp.lt.u32.totalorder %s963_s11, %s1552_s1 }
  0x15   : > { %p1269_p13 = pneg %p1253_p11 }
  0x17   : > { %p966_p0 = pnand %p1269_p13, %p964_p12 }
  0x19   : > { %p967_p3 = pneg %p966_p0 }
  0x1b   : > { %p972_p7 = pnand %p970_p5, %p967_p3 }
  0x1d   : > { %975 = shalt.err (!%p972_p7)
}
  0x1e   : > { %s976_s17 = scalar_lea.vmem %s1246_s28, 512  ;;  %p984_p2 = scmp.lt.s32.totalorder %s1246_s28, %s1246_s28 }
  0x1f   : > { %p977_p9 = scmp.ne.s32.totalorder %s1246_s28, %s976_s17  ;;  %p985_p6 = scmp.lt.s32.totalorder %s976_s17, %s976_s17 }
  0x21   : > { %p979_p10 = pnand %p977_p9, %p1269_p13  ;;  %p986_p12 = por %p985_p6, %p984_p2 }
  0x23   : > { %p980_p1 = pneg %p979_p10 }
  0x25   : > { %p987_p0 = pnand %p986_p12, %p980_p1 }
  0x27   : > { %990 = shalt.err (!%p987_p0)
}
  0x28   : > { %s1156_s23 = smov 256   ;;  %s1157_s27 = smov 16  }
  0x29   : > { %891 = dma.hbm_to_vmem [thread:$0]  (!%p1253_p11), %s1552_s1, 512, %s1246_s28, [#allocation6], %s1156_s23, %s1156_s23, %s1157_s27  }
  0x2a   : > { %s991_s11 = scalar_lea.hbm %s1553_s2, 128 }
  0x2b   : > { %p992_p2 = scmp.ne.s32.totalorder %s1553_s2, %s991_s11  ;;  %p998_p10 = scmp.lt.u32.totalorder %s991_s11, %s1553_s2 }
  0x2d   : > { %p994_p1 = pnand %p992_p2, %p1269_p13 }
  0x2f   : > { %p995_p6 = pneg %p994_p1 }
  0x31   : > { %p1000_p3 = pnand %p998_p10, %p995_p6 }
  0x33   : > { %1003 = shalt.err (!%p1000_p3)
}
  0x34   : > { %s1004_s28 = scalar_lea.vmem %s1257_s6, 128  ;;  %p1012_p12 = scmp.lt.s32.totalorder %s1257_s6, %s1257_s6 }
  0x35   : > { %p1005_p5 = scmp.ne.s32.totalorder %s1257_s6, %s1004_s28  ;;  %p1013_p0 = scmp.lt.s32.totalorder %s1004_s28, %s1004_s28 }
  0x37   : > { %p1007_p7 = pnand %p1005_p5, %p1269_p13  ;;  %p1014_p2 = por %p1013_p0, %p1012_p12 }
  0x39   : > { %p1008_p9 = pneg %p1007_p7 }
  0x3b   : > { %p1015_p1 = pnand %p1014_p2, %p1008_p9 }
  0x3d   : > { %1018 = shalt.err (!%p1015_p1)
}
  0x3e   : > { %894 = dma.hbm_to_vmem [thread:$0]  (!%p1253_p11), %s1553_s2, 128, %s1257_s6, [#allocation6]  }
  0x3f   : > { %s1019_s7 = scalar_lea.hbm %s1555_s4, 256 }
  0x40   : > { %p1020_p6 = scmp.ne.s32.totalorder %s1555_s4, %s1019_s7  ;;  %p1026_p5 = scmp.lt.u32.totalorder %s1019_s7, %s1555_s4 }
  0x42   : > { %p1022_p10 = pnand %p1020_p6, %p1269_p13 }
  0x44   : > { %p1023_p3 = pneg %p1022_p10 }
  0x46   : > { %p1028_p7 = pnand %p1026_p5, %p1023_p3 }
  0x48   : > { %1031 = shalt.err (!%p1028_p7)
}
  0x49   : > { %s1032_s13 = scalar_lea.vmem %s204_s8, 256  ;;  %p1040_p2 = scmp.lt.s32.totalorder %s204_s8, %s204_s8 }
  0x4a   : > { %p1033_p9 = scmp.ne.s32.totalorder %s204_s8, %s1032_s13  ;;  %p1041_p1 = scmp.lt.s32.totalorder %s1032_s13, %s1032_s13 }
  0x4c   : > { %p1035_p12 = pnand %p1033_p9, %p1269_p13  ;;  %p1042_p4 = por %p1041_p1, %p1040_p2 }
  0x4e   : > { %p1036_p0 = pneg %p1035_p12 }
  0x50   : > { %p1043_p8 = pnand %p1042_p4, %p1036_p0 }
  0x52   : > { %1046 = shalt.err (!%p1043_p8)
}
  0x53   : > { %s1158_s6 = smov 128   ;;  %s1159_s14 = smov 8  }
  0x54   : > { %897 = dma.hbm_to_vmem [thread:$0]  (!%p1253_p11), %s1555_s4, 256, %s204_s8, [#allocation9], %s1158_s6, %s1158_s6, %s1159_s14  }
  0x55   : > { %s1333_s28 = sadd.s32 1, %s1151_s21   ;;  %s30_s23 = sadd.s32 1, %s1147_s20 }
  0x56   : > { %s27_s17 = ssub.s32 %s1151_s21, %s1333_s28  ;;  %p37_p8 = scmp.ne.s32.totalorder %s1147_s20, %s1143_s19 }
  0x57   : > { %p28_p4 = scmp.eq.s32.totalorder %s27_s17, 0  ;;  %p38_p13 = scmp.eq.s32.totalorder %s1151_s21, 0 }
  0x58   : > { %p909_p6 = scmp.lt.s32.totalorder %s1151_s21, 2  ;;  %p1565_p3 = scmp.eq.s32.totalorder %s1223_s22, 1 }
  0x59   : > { %s1343_s27 = scalar_select %p28_p4, %s1147_s20, %s30_s23  }
  0x5a   : > { %p39_p10 = por %p38_p13, %p37_p8  ;;  %p1347_p5 = por %p1565_p3, %p37_p8 }
  0x5b   : > { %s217_s29 = sand.u32 1, %s1147_s20   ;;  %s850_s7 = sshll.u32 %s1151_s21, 8 }
  0x5c   : > { %s832_s8 = sshll.u32 %s217_s29, 4  ;;  %s1356_s11 = scalar_lea.hbm %s1551_s0, %s850_s7 }
  0x5d   : > { %s221_s12 = scalar_lea.vmem [#allocation2], %s832_s8  ;;  %p1358_p11 = pnand %p909_p6, %p39_p10 }
  0x5e   : > { %s229_s13 = sshll.u32 %s221_s12, 4  ;;  %s218_s14 = scalar_lea.sflag [#allocation3], %s217_s29  ;;  %s1362_s13 = int_to_ptr.vmem [resolvable:$true] %s229_s13 }
  0x5f   : > { %s1047_s15 = scalar_lea.hbm %s1356_s11, 256  ;;  %p1049_p9 = pneg %p1358_p11 }
  0x60   : > { %p1048_p7 = scmp.ne.s32.totalorder %s1356_s11, %s1047_s15  ;;  %s1052_s23 = scalar_lea.hbm %s1551_s0, 512 }
  0x61   : > { %p1053_p2 = scmp.lt.u32.totalorder %s1356_s11, %s1551_s0  ;;  %p1054_p1 = scmp.lt.u32.totalorder %s1052_s23, %s1047_s15 }
  0x62   : > { %p1050_p12 = pnand %p1049_p9, %p1048_p7  ;;  %p1056_p8 = scmp.lt.u32.totalorder %s1047_s15, %s1356_s11 }
  0x63   : > { %p1055_p4 = por %p1054_p1, %p1053_p2 }
  0x64   : > { %p1051_p0 = pneg %p1050_p12 }
  0x65   : > { %p1057_p13 = por %p1056_p8, %p1055_p4 }
  0x67   : > { %p1058_p6 = pnand %p1057_p13, %p1051_p0 }
  0x69   : > { %1061 = shalt.err (!%p1058_p6)
}
  0x6a   : > { %s1062_s29 = scalar_lea.vmem %s1362_s13, 256  ;;  %s1160_s9 = smov [#allocation2]  }
  0x6b   : > { %p1063_p10 = scmp.ne.s32.totalorder %s1362_s13, %s1062_s29  ;;  %s1067_s10 = sshll.u32 %s1160_s9, 4  ;;  %s1068_s10 = int_to_ptr.vmem [resolvable:$false] %s1067_s10 }
  0x6c   : > { %s1069_s12 = scalar_lea.vmem %s1068_s10, 512  ;;  %p1070_p12 = scmp.lt.s32.totalorder %s1362_s13, %s1068_s10 }
  0x6d   : > { %p1065_p3 = pnand %p1063_p10, %p1049_p9  ;;  %p1071_p2 = scmp.lt.s32.totalorder %s1069_s12, %s1062_s29 }
  0x6f   : > { %p1066_p7 = pneg %p1065_p3  ;;  %p1072_p1 = por %p1071_p2, %p1070_p12 }
  0x71   : > { %p1073_p4 = pnand %p1072_p1, %p1066_p7 }
  0x73   : > { %1076 = shalt.err (!%p1073_p4)
}
  0x74   : > { %901 = dma.hbm_to_vmem [thread:$0]  (!%p1358_p11), %s1356_s11, 256, %s1362_s13, %s218_s14  }
  0x75   : > { %p1568_p0 = scmp.ne.s32.totalorder %s1562_s26, 0 }
  0x76   : > { %s1392_s15 = sand.u32 (!%p1568_p0), 1, %s1143_s19   ;;  %p1569_p9 = scmp.ne.s32.totalorder (!%p1568_p0), %s1560_s24, 0 }
  0x77   : > { %238 = sbr.rel (%p1568_p0) target bundleno = 955 (0x3bb), region = 40  ;;  %s836_s16 = sshll.u32 (!%p1568_p0), %s1392_s15, 4 }
  0x78   : > { %s241_s17 = scalar_lea.sflag (!%p1568_p0), [#allocation3], %s1392_s15  ;;  %s244_s23 = scalar_lea.vmem (!%p1568_p0), [#allocation2], %s836_s16 }
  0x7e   : > { %1122 = dma.done.wait (%p1569_p9), %s241_s17, 256  }
  0x7f   : > { %1124 = vsyncadd (%p1569_p9), %s241_s17, 4294967040  ;;  %p1570_p8 = scmp.eq.s32.totalorder %s1223_s22, 0 }
  0x81   : > { %1126 = dma.done.wait (%p1570_p8), [#allocation6], 640   ;;  %p1571_p11 = pmov %p1570_p8 }
  0x82   : > { %p1572_p13 = pmov %p1570_p8 }
  0x83   : > { %1128 = vsyncadd (%p1571_p11), [#allocation6], 4294966656 }
  0x84   : > { %1130 = dma.done.wait (%p1572_p13), [#allocation9], 256   ;;  %p1573_p6 = pmov %p1570_p8 }
  0x85   : > { %v1161_v0 = vmov 0.0   ;;  %v1410_v1 = vld [vmem:[%s244_s23 + $0x8] sm:$0xff]  ;;  %v1412_v2 = vld [vmem:[%s244_s23] sm:$0xff]  ;;  %vm288_vm0 = vcmask 64512   ;;  %s1162_s24 = smov 16   ;;  %s1163_s26 = smov 17   ;;  %v369_v10 = vlaneseq }
  0x86   : > { %1132 = vsyncadd (%p1573_p6), [#allocation9], 4294967040  ;;  %356 = vmatprep.mubr.f32.mxu0 %v1161_v0  ;;  %611 = vmatprep.mubr.f32.mxu1 %v1161_v0  ;;  %v286_v3 = vmax.f32 %v1410_v1, 0.0  ;;  %v285_v4 = vmax.f32 %v1412_v2, 0.0  ;;  %v287_v5 = vld [vmem:[#allocation7] sm:$0xff]  ;;  %s1164_s11 = smov 15  }
  0x87   : > { %s1165_s13 = smov 1   ;;  %s1166_s6 = smov 127   ;;  %v377_v13 = vshrl.u32 %v369_v10, 7  ;;  %v1443_v14 = vand.u32 127, %v369_v10  ;;  %vm543_vm9 = vcmask 588800   ;;  %vm622_vm10 = vcmask 130048  }
  0x88   : > { %292 = vmatprep.subr.mxu0 %v286_v3  ;;  %s1167_s14 = smov 113   ;;  %s1168_s7 = smov 112   ;;  %v396_v19 = vld [vmem:[#allocation5 + $0x1] ss:$8 sm:$0x3] }
  0x89   : > { %293 = vmatpush1.msra.mxu0 %v285_v4  ;;  %s1169_s8 = smov 111   ;;  %v1445_v16 = vsub.s32 0, %v377_v13  ;;  %v1447_v18 = vsub.s32 1, %v377_v13  ;;  %vm392_vm1 = vcmp.lt.s32.totalorder %v1443_v14, 16  ;;  %vm414_vm2 = vcmp.lt.s32.totalorder %v1443_v14, 15  ;;  %s840_s10 = sshll.u32 %s1392_s15, 5 }
  0x8a   : > { %841 = vmatmul.mubr.msk.f32.vlgmr.msra.gmra.mrb[0].mxu0 %vm288_vm0, %v287_v5  ;;  %v440_v20 = vld [vmem:[#allocation5 + $0x3] ss:$8 sm:$0x3]  ;;  %v374_v21 = vld [vmem:[#allocation5] ss:$8 sm:$0x3] }
  0x8b   : > { %693 = vmatprep.mubr.f32.mxu0 %v1161_v0  ;;  %v401_v22 = vrot.slane %v396_v19, %v1445_v16  ;;  %v418_v24 = vld [vmem:[#allocation5 + $0x2] ss:$8 sm:$0x3]  ;;  %v405_v26 = vrot.slane %v396_v19, %v1447_v18  ;;  %vm436_vm3 = vcmp.lt.s32.totalorder %v1443_v14, 1  ;;  %v449_v30 = vrot.slane %v440_v20, %v1447_v18  ;;  %s282_s12 = scalar_lea.vmem [#allocation10], %s840_s10  ;;  %s851_s17 = sshll.u32 %s1223_s22, 9 }
  0x8c   : > { %v462_v29 = vld [vmem:[#allocation5 + $0x5] ss:$8 sm:$0x3]  ;;  %vm371_vm4 = vcmp.lt.s32.totalorder %v1443_v14, 17  ;;  %v379_v31 = vrot.slane %v374_v21, %v1445_v16  ;;  %v383_v32 = vrot.slane %v374_v21, %v1447_v18  ;;  %v427_v33 = vrot.slane %v418_v24, %v1447_v18  ;;  %s724_s16 = sshll.u32 %s282_s12, 4  ;;  %s1170_s22 = smov [#allocation10]   ;;  %s1501_s16 = int_to_ptr.vmem [resolvable:$true] %s724_s16 }
  0x8d   : > { %v445_v34 = vrot.slane %v440_v20, %v1445_v16  ;;  %vm458_vm5 = vcmp.lt.s32.totalorder %v1443_v14, 127  ;;  %v471_v38 = vrot.slane %v462_v29, %v1447_v18  ;;  %v423_v48 = vrot.slane %v418_v24, %v1445_v16  ;;  %v484_v61 = vld [vmem:[#allocation5 + $0x6] ss:$8 sm:$0x3] }
  0x8e   : > { %v467_v56 = vrot.slane %v462_v29, %v1445_v16  ;;  %v506_v63 = vld [vmem:[#allocation5 + $0x7] ss:$8 sm:$0x3]  ;;  %vm480_vm6 = vcmp.lt.s32.totalorder %v1443_v14, 113  ;;  %v489_v10 = vrot.slane %v484_v61, %v1445_v16  ;;  %vm502_vm7 = vcmp.lt.s32.totalorder %v1443_v14, 112 }
  0x8f   : > { %v528_v19 = vld [vmem:[#allocation5 + $0x10] ss:$8 sm:$0x3]  ;;  %vm524_vm8 = vcmp.lt.s32.totalorder %v1443_v14, 111 }
 0x15d   : > { %v358_v6 = vpop.f32.mrb[0].mxu0 }
 0x15e   : > { %v1421_v7 = vmax.f32 %v358_v6, 0.0  ;;  %v360_v8 = vpop.f32.mrb[1].mxu0 }
 0x15f   : > { %v1426_v9 = vmax.f32 %v360_v8, 0.0 }
 0x160   : > { %388 = vrot.lane.b32.xlu1 %v1421_v7, %s1162_s24  ;;  %365 = vrot.lane.b32.xlu0 %v1421_v7, %s1163_s26 }
 0x164   : > { %410 = vrot.lane.b32.xlu0 %v1421_v7, %s1164_s11  ;;  %390 = vrot.lane.b32.xlu1 %v1426_v9, %s1162_s24 }
 0x168   : > { %432 = vrot.lane.b32.xlu0 %v1421_v7, %s1165_s13  ;;  %412 = vrot.lane.b32.xlu1 %v1426_v9, %s1164_s11  ;;  %s1506_s11 = scalar_lea.hbm %s1556_s5, %s851_s17 }
 0x16c   : > { %434 = vrot.lane.b32.xlu1 %v1426_v9, %s1165_s13  ;;  %367 = vrot.lane.b32.xlu0 %v1426_v9, %s1163_s26  ;;  %s711_s13 = scalar_lea.sflag [#allocation4], %s1392_s15 }
 0x170   : > { %456 = vrot.lane.b32.xlu1 %v1426_v9, %s1166_s6  ;;  %454 = vrot.lane.b32.xlu0 %v1421_v7, %s1166_s6  ;;  %s1077_s6 = scalar_lea.vmem %s1501_s16, 512 }
 0x171   : > { %p1078_p10 = scmp.ne.s32.totalorder %s1501_s16, %s1077_s6 }
 0x173   : > { %p1079_p3 = pnand %p1078_p10, %p1347_p5 }
 0x174   : > { %478 = vrot.lane.b32.xlu1 %v1426_v9, %s1167_s14  ;;  %476 = vrot.lane.b32.xlu0 %v1421_v7, %s1167_s14  ;;  %s1081_s14 = sshll.u32 %s1170_s22, 4  ;;  %s1082_s14 = int_to_ptr.vmem [resolvable:$false] %s1081_s14 }
 0x175   : > { %p1080_p7 = pneg %p1079_p3  ;;  %p1084_p12 = scmp.lt.s32.totalorder %s1501_s16, %s1082_s14 }
 0x178   : > { %500 = vrot.lane.b32.xlu1 %v1426_v9, %s1168_s7  ;;  %498 = vrot.lane.b32.xlu0 %v1421_v7, %s1168_s7  ;;  %s1083_s7 = scalar_lea.vmem %s1082_s14, 1024 }
 0x179   : > { %p1085_p2 = scmp.lt.s32.totalorder %s1083_s7, %s1077_s6 }
 0x17b   : > { %p1086_p1 = por %p1085_p2, %p1084_p12 }
 0x17c   : > { %522 = vrot.lane.b32.xlu1 %v1426_v9, %s1169_s8  ;;  %520 = vrot.lane.b32.xlu0 %v1421_v7, %s1169_s8 }
 0x17d   : > { %p1087_p4 = pnand %p1086_p1, %p1080_p7 }
 0x1d2   : > { %v389_v11 = vpop.permute.xlu1 %388  ;;  %v366_v12 = vpop.permute.xlu0 %365 }
 0x1d6   : > { %v411_v15 = vpop.permute.xlu0 %410  ;;  %v391_v17 = vpop.permute.xlu1 %390 }
 0x1d7   : > { %v393_v27 = vsel %vm392_vm1, %v389_v11, %v391_v17  ;;  %v394_v28 = vsel %vm392_vm1, %v391_v17, %v389_v11  ;;  %v493_v11 = vrot.slane %v484_v61, %v1447_v18  ;;  %v515_v17 = vrot.slane %v506_v63, %v1447_v18 }
 0x1d8   : > { %v408_v35 = vmul.f32 %v401_v22, %v394_v28  ;;  %v409_v39 = vmul.f32 %v405_v26, %v393_v27 }
 0x1da   : > { %v433_v23 = vpop.permute.xlu0 %432  ;;  %v413_v25 = vpop.permute.xlu1 %412 }
 0x1db   : > { %v415_v40 = vsel %vm414_vm2, %v411_v15, %v413_v25  ;;  %v416_v49 = vsel %vm414_vm2, %v413_v25, %v411_v15  ;;  %v511_v15 = vrot.slane %v506_v63, %v1445_v16 }
 0x1dc   : > { %v431_v50 = vmul.f32 %v427_v33, %v415_v40  ;;  %v430_v62 = vmul.f32 %v423_v48, %v416_v49 }
 0x1de   : > { %v435_v36 = vpop.permute.xlu1 %434  ;;  %v368_v37 = vpop.permute.xlu0 %367 }
 0x1df   : > { %v437_v41 = vsel %vm436_vm3, %v433_v23, %v435_v36  ;;  %v372_v42 = vsel %vm371_vm4, %v366_v12, %v368_v37  ;;  %v373_v43 = vsel %vm371_vm4, %v368_v37, %v366_v12  ;;  %v438_v44 = vsel %vm436_vm3, %v435_v36, %v433_v23 }
 0x1e0   : > { %v453_v45 = vmul.f32 %v449_v30, %v437_v41  ;;  %v386_v46 = vmul.f32 %v379_v31, %v373_v43  ;;  %v387_v47 = vmul.f32 %v383_v32, %v372_v42  ;;  %v452_v55 = vmul.f32 %v445_v34, %v438_v44  ;;  %v620_v43 = vld [vmem:[#allocation8] sm:$0xff]  ;;  %v621_v44 = vld [vmem:[#allocation8 + $0x8] sm:$0xff] }
 0x1e2   : > { %v457_v51 = vpop.permute.xlu1 %456  ;;  %v455_v52 = vpop.permute.xlu0 %454  ;;  %v852_v53 = vpack.c.bf16 %v409_v39, %v387_v47  ;;  %v854_v54 = vpack.c.bf16 %v408_v35, %v386_v46  ;;  %v856_v60 = vpack.c.bf16 %v453_v45, %v431_v50  ;;  %v858_v12 = vpack.c.bf16 %v452_v55, %v430_v62 }
 0x1e3   : > { %v460_v57 = vsel %vm458_vm5, %v457_v51, %v455_v52  ;;  %v459_v58 = vsel %vm458_vm5, %v455_v52, %v457_v51  ;;  %v533_v35 = vrot.slane %v528_v19, %v1445_v16 }
 0x1e4   : > { %v475_v59 = vmul.f32 %v471_v38, %v460_v57  ;;  %853 = vmatprep.subr.bf16.mxu1 %v852_v53  ;;  %v474_v8 = vmul.f32 %v467_v56, %v459_v58  ;;  %v542_v38 = vld [vmem:[%s1554_s3] sm:$0xff] }
 0x1e5   : > { %855 = vmatpush1.bf16.msra.mxu1 %v854_v54 }
 0x1e6   : > { %v479_v5 = vpop.permute.xlu1 %478  ;;  %857 = vmatprep.subr.bf16.mxu1 %v856_v60  ;;  %v477_v6 = vpop.permute.xlu0 %476  ;;  %v860_v13 = vpack.c.bf16 %v475_v59, %v1426_v9  ;;  %v862_v26 = vpack.c.bf16 %v474_v8, %v1421_v7  ;;  %v537_v9 = vrot.slane %v528_v19, %v1447_v18 }
 0x1e7   : > { %v481_v20 = vsel %vm480_vm6, %v477_v6, %v479_v5  ;;  %v482_v21 = vsel %vm480_vm6, %v479_v5, %v477_v6 }
 0x1e8   : > { %v496_v27 = vmul.f32 %v489_v10, %v481_v20  ;;  %v497_v28 = vmul.f32 %v493_v11, %v482_v21 }
 0x1e9   : > { %859 = vmatpush1.bf16.msra.mxu1 %v858_v12 }
 0x1ea   : > { %v501_v22 = vpop.permute.xlu1 %500  ;;  %861 = vmatprep.subr.bf16.mxu1 %v860_v13  ;;  %v499_v23 = vpop.permute.xlu0 %498 }
 0x1eb   : > { %v503_v24 = vsel %vm502_vm7, %v499_v23, %v501_v22  ;;  %v504_v25 = vsel %vm502_vm7, %v501_v22, %v499_v23 }
 0x1ec   : > { %v518_v29 = vmul.f32 %v511_v15, %v503_v24  ;;  %v519_v30 = vmul.f32 %v515_v17, %v504_v25 }
 0x1ed   : > { %863 = vmatpush1.bf16.msra.mxu1 %v862_v26 }
 0x1ee   : > { %v523_v31 = vpop.permute.xlu1 %522  ;;  %v521_v32 = vpop.permute.xlu0 %520  ;;  %v864_v33 = vpack.c.bf16 %v519_v30, %v497_v28  ;;  %v866_v34 = vpack.c.bf16 %v518_v29, %v496_v27 }
 0x1ef   : > { %v526_v36 = vsel %vm524_vm8, %v523_v31, %v521_v32  ;;  %v525_v37 = vsel %vm524_vm8, %v521_v32, %v523_v31 }
 0x1f0   : > { %v541_v7 = vmul.f32 %v537_v9, %v526_v36  ;;  %865 = vmatprep.subr.bf16.mxu1 %v864_v33  ;;  %v540_v18 = vmul.f32 %v533_v35, %v525_v37 }
 0x1f1   : > { %867 = vmatpush1.bf16.msra.mxu1 %v866_v34 }
 0x1f2   : > { %563 = vmatprep.subr.mxu1 %v541_v7 }
 0x1f5   : > { %564 = vmatpush1.msra.mxu1 %v540_v18 }
 0x1f6   : > { %842 = vmatmul.mubr.msk.f32.vlgmr.msra.gmra.mrb[0].mxu1 %vm543_vm9, %v542_v38 }
 0x2c9   : > { %v613_v16 = vpop.f32.mrb[0].mxu1 }
 0x2ca   : > { %v618_v39 = vmax.f32 %v613_v16, 0.0  ;;  %v615_v40 = vpop.f32.mrb[1].mxu1 }
 0x2cb   : > { %v619_v41 = vmax.f32 %v615_v40, 0.0 }
 0x2cc   : > { %v870_v42 = vpack.c.bf16 %v285_v4, %v618_v39 }
 0x2cd   : > { %v868_v14 = vpack.c.bf16 %v286_v3, %v619_v41 }
 0x2cf   : > { %869 = vmatprep.subr.bf16.mxu0 %v868_v14 }
 0x2d0   : > { %871 = vmatpush1.bf16.msra.mxu0 %v870_v42 }
 0x2d3   : > { %843 = vmatmul.mubr.msk.f32.vlgmr.msra.gmra.mrb[2].mxu0 %vm622_vm10, %v620_v43 }
 0x2d4   : > { %699 = vmatprep.mubr.f32.mxu0 %v1161_v0 }
 0x2d7   : > { %844 = vmatmul.mubr.msk.f32.gmra.mrb[4].mxu0 %vm622_vm10, %v621_v44 }
 0x3a6   : > { %v695_v45 = vpop.f32.mrb[2].mxu0 }
 0x3a7   : > { %706 = vst [vmem:[%s282_s12] sm:$0xff] %v695_v45  ;;  %v697_v1 = vpop.f32.mrb[3].mxu0 }
 0x3a8   : > { %707 = vst [vmem:[%s282_s12 + $0x8] sm:$0xff] %v697_v1 }
 0x3aa   : > { %v701_v2 = vpop.f32.mrb[4].mxu0 }
 0x3ab   : > { %708 = vst [vmem:[%s282_s12 + $0x10] sm:$0xff] %v701_v2  ;;  %v703_v0 = vpop.f32.mrb[5].mxu0 }
 0x3ac   : > { %709 = vst [vmem:[%s282_s12 + $0x18] sm:$0xff] %v703_v0 }
 0x3ad   : > { %1090 = shalt.err (!%p1087_p4)
}
 0x3ae   : > { %s1091_s8 = scalar_lea.hbm %s1506_s11, 512  ;;  %s1095_s10 = scalar_lea.hbm %s1556_s5, 1024 }
 0x3af   : > { %p1092_p0 = scmp.ne.s32.totalorder %s1506_s11, %s1091_s8  ;;  %p1096_p11 = scmp.lt.u32.totalorder %s1506_s11, %s1556_s5 }
 0x3b0   : > { %p1097_p13 = scmp.lt.u32.totalorder %s1095_s10, %s1091_s8  ;;  %p1099_p10 = scmp.lt.u32.totalorder %s1091_s8, %s1506_s11 }
 0x3b1   : > { %p1093_p9 = pnand %p1092_p0, %p1347_p5 }
 0x3b2   : > { %p1098_p6 = por %p1097_p13, %p1096_p11 }
 0x3b3   : > { %p1094_p8 = pneg %p1093_p9 }
 0x3b4   : > { %p1100_p3 = por %p1099_p10, %p1098_p6 }
 0x3b6   : > { %p1101_p7 = pnand %p1100_p3, %p1094_p8 }
 0x3b8   : > { %1104 = shalt.err (!%p1101_p7)
}
 0x3b9   : > { %s1171_s23 = smov 256  }
 0x3ba   : > { %886 = dma.vmem_to_hbm [thread:$0]  (%p1347_p5), %s1501_s16, 512, %s1506_s11, %s711_s13, %s1171_s23, %s1171_s23, %s1162_s24  }
 0x3bb PF: > { %s739_s26 = sand.u32 1, %s1139_s18   ;;  %p1574_p12 = scmp.ne.s32.totalorder %s1561_s25, 0 }
 0x3bc   : > { %p1575_p2 = scmp.ge.s32.totalorder %s1151_s21, 2  ;;  %s740_s6 = scalar_lea.sflag [#allocation4], %s739_s26 }
 0x3be   : > { %p903_p1 = pnand %p1575_p2, %p1574_p12 }
 0x3c0   : > { %1134 = dma.done.wait (!%p903_p1), %s740_s6, 512  }
 0x3c1   : > { %1136 = vsyncadd (!%p903_p1), %s740_s6, 4294966784  ;;  %p20_p4 = scmp.ge.s32.totalorder %s1333_s28, 4   ;;  %s1576_s18 = smov %s1143_s19 }
 0x3c2   : > { %s1577_s19 = smov %s1147_s20  ;;  %s1578_s20 = smov %s1343_s27 }
 0x3c3   : > { %s1579_s21 = smov %s1333_s28  ;;  %22 = sbr.rel (!%p20_p4) target bundleno = 7 (0x7), region = 104 }
 0x3ca   :  { %745 = vsyncpa [#allocation3], 1 }
 0x3cb   :  { %747 = vsyncpa [#allocation3 + $0x1], 1 }
 0x3cc   :  { %748 = vsyncpa [#allocation6], 1 }
 0x3cd   :  { %749 = vsyncpa [#allocation9], 1 }
 0x3ce   :  { %750 = vsyncpa [#allocation4], 1 }
 0x3cf   :  { %752 = vsyncpa [#allocation4 + $0x1], 1 }

</bundles_post_ra>
